<compile_context>
chip_gen: v6e
topology: v6e:2x2x1
jax: 0.10.0
libtpu: 0.0.40
codegen_flags: <defaults>
</compile_context>

<pallas_src>
import jax
import jax.numpy as jnp
from jax.experimental import pallas as pl
from jax.experimental.pallas import tpu as pltpu


# ----------------------------- Pallas kernel ------------------------------- #

def identity_copy_kernel(x_ref, o_ref):
    """Copy the current lane-dense tile through VMEM unchanged."""
    o_ref[...] = x_ref[...]


# ----------------------------- module wrapper ------------------------------ #

def pallas_identity(x, *, tm=1024):
    """Identity.forward(x) via a lane-dense tiled Pallas copy.

    Works for any shape/dtype: the array is flattened, padded to a
    [rows_padded, 128] slab (128 = lane width, rows a multiple of the row
    tile), streamed through the TPU in `tm`-row tiles, then sliced/reshaped
    back to the original shape.
    """
    orig_shape = x.shape
    dtype = x.dtype
    n = x.size

    LANES = 128
    rows = pl.cdiv(n, LANES)

    # Row tile: as large as practical (amortizes ~0.35 us per grid step and
    # keeps the DMA pipeline full), a multiple of 8 sublanes, and never larger
    # than the (rounded-up) row count.  1024 rows * 128 lanes * 4 B = 512 KiB
    # per buffer -> ~2 MiB total with double-buffering, well under the default
    # scoped-VMEM limit on v5e/v6e/v7x.
    tm = max(8, min(tm, ((rows + 7) // 8) * 8))
    rows_padded = pl.cdiv(rows, tm) * tm

    # Lane-dense slab: last dim = 128 -> every load/store is a full vreg.
    flat = jnp.ravel(x)
    pad = rows_padded * LANES - n
    if pad:
        flat = jnp.pad(flat, (0, pad))
    slab = flat.reshape(rows_padded, LANES)

    out_slab = pl.pallas_call(
        identity_copy_kernel,
        out_shape=jax.ShapeDtypeStruct((rows_padded, LANES), dtype),
        grid_spec=pltpu.PrefetchScalarGridSpec(
            num_scalar_prefetch=0,
            grid=(rows_padded // tm,),
            in_specs=[pl.BlockSpec((tm, LANES), lambda i: (i, 0))],
            out_specs=pl.BlockSpec((tm, LANES), lambda i: (i, 0)),
        ),
        # In-place: the output buffer is the (freshly materialized, donatable)
        # input slab, so the identity costs one HBM read + one HBM write of
        # the same buffer, with no second allocation.
        input_output_aliases={0: 0},
        compiler_params=pltpu.CompilerParams(
            dimension_semantics=("parallel",)),
    )(slab)

    out_flat = out_slab.reshape(-1)
    if pad:
        out_flat = out_flat[:n]
    return out_flat.reshape(orig_shape)


# ----------------------------------- main ----------------------------------- #

if __name__ == "__main__":
    key = jax.random.PRNGKey(0)
    k1, k2 = jax.random.split(key)

    # Small shapes consistent with an image-style module input.
    x = jax.random.normal(k1, (2, 4, 16, 16), jnp.float32)
    out = jax.block_until_ready(pallas_identity(x))
    assert out.shape == x.shape and out.dtype == x.dtype
    assert jnp.array_equal(out, x), "Identity mismatch (aligned shape)"

    # Awkward, non-128-aligned shape to exercise the pad / tail path.
    y = jax.random.normal(k2, (3, 5, 7, 9), jnp.float32)
    out_y = jax.block_until_ready(pallas_identity(y))
    assert out_y.shape == y.shape and out_y.dtype == y.dtype
    assert jnp.array_equal(out_y, y), "Identity mismatch (ragged shape)"

    print("KERNEL_OK")
</pallas_src>

<mosaic_0001>
module attributes {stable_mosaic.version = 11 : i64} {
  func.func @identity_copy_kernel(%arg0: i32, %arg1: memref<16x128xf32, #tpu.memory_space<vmem>>, %arg2: memref<16x128xf32, #tpu.memory_space<vmem>>) attributes {dimension_semantics = [#tpu.dimension_semantics<parallel>], iteration_bounds = array<i64: 1>, scalar_prefetch = 0 : i64, scratch_operands = 0 : i64, tpu.core_type = #tpu.core_type<tc>, window_params = [{transform_indices = @transform_0, window_bounds = array<i64: 16, 128>}, {transform_indices = @transform_1, window_bounds = array<i64: 16, 128>}]} {
    %c0 = arith.constant 0 : index
    %c0_0 = arith.constant 0 : index
    %0 = vector.load %arg1[%c0, %c0_0] : memref<16x128xf32, #tpu.memory_space<vmem>>, vector<16x128xf32>
    %c0_1 = arith.constant 0 : index
    %c0_2 = arith.constant 0 : index
    %1 = vector.load %arg2[%c0_1, %c0_2] : memref<16x128xf32, #tpu.memory_space<vmem>>, vector<16x128xf32>
    tpu.vector_store %arg2[%c0_1, %c0_2], %0 {strides = array<i32>} : memref<16x128xf32, #tpu.memory_space<vmem>>, vector<16x128xf32>,
    return
  }
  func.func @transform_0(%arg0: i32) -> (i32, i32) {
    %c0_i32 = arith.constant 0 : i32
    %c0_i32_0 = arith.constant 0 : i32
    return %arg0, %c0_i32 : i32, i32
  }
  func.func @transform_1(%arg0: i32) -> (i32, i32) {
    %c0_i32 = arith.constant 0 : i32
    %c0_i32_0 = arith.constant 0 : i32
    return %arg0, %c0_i32 : i32, i32
  }
}

</mosaic_0001>

<bundles_post_ra>
// kernel: tpu_custom_call.1
= control target key start
LH: loop header
LB: loop body
LE: loop exit
PB: predicated region body
PF: predicated region fallthrough
CT: control target
= control target key end

     0   :  { %6 = vsyncpa [#allocation3], 0  ;;  %s112_s0 = inlined_call_operand.hbm [shape: f32[16,128], index: 0, kind: input, shape index: {}, may-alias: {0,1}]   ;;  %s113_s1 = inlined_call_operand.hbm [shape: f32[16,128], index: 1, kind: output, shape index: {}, may-alias: {0,1}]  }
   0x1   :  { %7 = vsyncpa [#allocation4], 0  ;;  %s92_s6 = smov [#allocation2]  }
   0x2   :  { %s13_s7 = sshll.u32 %s92_s6, 4  ;;  %s14_s7 = int_to_ptr.vmem [resolvable:$true] %s13_s7 }
   0x3   :  { %s56_s8 = scalar_lea.vmem %s14_s7, 256  ;;  %p61_p1 = scmp.lt.s32.totalorder %s14_s7, %s14_s7 }
   0x4   :  { %p57_p0 = scmp.ne.s32.totalorder %s14_s7, %s56_s8  ;;  %p62_p2 = scmp.lt.s32.totalorder %s56_s8, %s56_s8 }
   0x6   :  { %p63_p3 = por %p62_p2, %p61_p1 }
   0x8   :  { %p64_p4 = pnand %p63_p3, %p57_p0 }
   0xa   :  { %67 = shalt.err (!%p64_p4)
}
   0xb   :  { %s93_s9 = smov 128   ;;  %s94_s10 = smov 8  }
   0xc   :  { %19 = dma.hbm_to_vmem [thread:$0]  %s112_s0, 256, %s14_s7, [#allocation3], %s93_s9, %s93_s9, %s94_s10  }
   0xd   :  { %88 = dma.done.wait [#allocation3], 256  }
   0xe   :  { %89 = vsyncadd [#allocation3], 4294967040  ;;  %s95_s13 = smov [#allocation5]   ;;  %v23_v0 = vld [vmem:[#allocation2] sm:$0xff]  ;;  %v24_v1 = vld [vmem:[#allocation2 + $0x8] sm:$0xff] }
   0xf   :  { %s32_s14 = sshll.u32 %s95_s13, 4  ;;  %25 = vst [vmem:[#allocation5] sm:$0xff] %v23_v0  ;;  %26 = vst [vmem:[#allocation5 + $0x8] sm:$0xff] %v24_v1  ;;  %s33_s14 = int_to_ptr.vmem [resolvable:$true] %s32_s14 }
  0x10   :  { %s68_s15 = scalar_lea.vmem %s33_s14, 256  ;;  %p73_p6 = scmp.lt.s32.totalorder %s33_s14, %s33_s14 }
  0x11   :  { %p69_p5 = scmp.ne.s32.totalorder %s33_s14, %s68_s15  ;;  %p74_p7 = scmp.lt.s32.totalorder %s68_s15, %s68_s15 }
  0x13   :  { %p75_p8 = por %p74_p7, %p73_p6 }
  0x15   :  { %p76_p9 = pnand %p75_p8, %p69_p5 }
  0x17   :  { %79 = shalt.err (!%p76_p9)
}
  0x18   :  { %38 = dma.vmem_to_hbm [thread:$0]  %s33_s14, 256, %s113_s1, [#allocation4], %s93_s9, %s93_s9, %s94_s10  }
  0x19   :  { %90 = dma.done.wait [#allocation4], 256  }
  0x1a   :  { %91 = vsyncadd [#allocation4], 4294967040 }
  0x1b   :  { %42 = vsyncpa [#allocation3], 1 }
  0x1c   :  { %43 = vsyncpa [#allocation4], 1 }

</bundles_post_ra>
